<compile_context>
chip_gen: v7x
topology: tpu7x:2x2x1
jax: 0.10.0
libtpu: 0.0.40
codegen_flags: <defaults>
</compile_context>

<pallas_src>
import functools

import jax
import jax.numpy as jnp
from jax.experimental import pallas as pl
from jax.experimental.pallas import tpu as pltpu


# ---------------------------------------------------------------------------
# Kernels
# ---------------------------------------------------------------------------
def _matmul_bias_single_k_kernel(x_ref, w_ref, b_ref, o_ref):
    # Whole reduction in one step: no scratch accumulator, no init/finalize.
    acc = jnp.dot(x_ref[...], w_ref[...], preferred_element_type=jnp.float32)
    o_ref[...] = (acc + b_ref[...].astype(jnp.float32)).astype(o_ref.dtype)


def _matmul_bias_multi_k_kernel(x_ref, w_ref, b_ref, o_ref, acc_ref):
    k = pl.program_id(2)

    @pl.when(k == 0)
    def _():
        acc_ref[...] = jnp.zeros_like(acc_ref)

    acc_ref[...] += jnp.dot(x_ref[...], w_ref[...],
                            preferred_element_type=jnp.float32)

    @pl.when(k == pl.num_programs(2) - 1)
    def _():
        o_ref[...] = (acc_ref[...]
                      + b_ref[...].astype(jnp.float32)).astype(o_ref.dtype)


# ---------------------------------------------------------------------------
# One-time parameter packing (do this at load time, NOT per forward call)
# ---------------------------------------------------------------------------
def pack_neck2seq_params(weights, biases):
    """Repack the 9 nn.Linear parameters into single matmul operands.

    weights: [H, d_model, neck]  (PyTorch nn.Linear weight layout)
    biases:  [H, d_model]
    returns: w_cat [neck, H*d_model], b_cat [1, H*d_model]
      with  w_cat[k, h*d_model + d] == weights[h, d, k]
    """
    H, d_model, K = weights.shape
    assert biases.shape == (H, d_model)
    w_cat = jnp.transpose(weights, (2, 0, 1)).reshape(K, H * d_model)
    b_cat = biases.reshape(1, H * d_model)
    return w_cat, b_cat


# ---------------------------------------------------------------------------
# Tile selection helpers
# ---------------------------------------------------------------------------
def _ceil_mult(a, m):
    return ((a + m - 1) // m) * m


def _sublane_align(dtype):
    # 8 for 4-byte, 16 for 2-byte, 32 for 1-byte dtypes (sublane packing).
    return max(8, 32 // jnp.dtype(dtype).itemsize)


def _pick_tile(dim, req, align):
    """Pick a legal tile for `dim`; prefer no-padding choices.

    Returns (tile, padded_dim).
      * dim <= req            -> full-extent block, no padding, always legal.
      * exact divisor exists  -> largest aligned divisor <= req, no padding.
      * otherwise             -> aligned tile, dim zero-padded up to a multiple.
    """
    if dim <= req:
        return dim, dim
    t = (req // align) * align
    while t >= align:
        if dim % t == 0:
            return t, dim
        t -= align
    tile = max(align, (req // align) * align)
    return tile, _ceil_mult(dim, tile)


# ---------------------------------------------------------------------------
# Forward
# ---------------------------------------------------------------------------
@functools.partial(jax.jit, static_argnames=("n_heads", "tm", "tn", "tk"))
def neck2seq_forward(x, w_cat, b_cat, *, n_heads=9, tm=256, tn=1536, tk=1024):
    """JAX/Pallas equivalent of Neck2Seq.forward.

    x:      [B, neck]
    w_cat:  [neck, n_heads*d_model]   (from pack_neck2seq_params)
    b_cat:  [1, n_heads*d_model]
    returns [B, n_heads, d_model]  (== torch.stack([lin_h(x) for h], dim=1))
    """
    B, K = x.shape
    K_w, N = w_cat.shape
    assert K == K_w and b_cat.shape == (1, N) and N % n_heads == 0

    tm, M_pad = _pick_tile(B, tm, _sublane_align(x.dtype))
    tn, N_pad = _pick_tile(N, tn, 128)
    tk, K_pad = _pick_tile(K, tk, 128)

    if (M_pad, K_pad) != (B, K):
        x = jnp.pad(x, ((0, M_pad - B), (0, K_pad - K)))
    if (K_pad, N_pad) != (K, N):
        w_cat = jnp.pad(w_cat, ((0, K_pad - K), (0, N_pad - N)))
    if N_pad != N:
        b_cat = jnp.pad(b_cat, ((0, 0), (0, N_pad - N)))

    grid = (M_pad // tm, N_pad // tn, K_pad // tk)
    multi_k = grid[2] > 1

    kernel = _matmul_bias_multi_k_kernel if multi_k else _matmul_bias_single_k_kernel
    scratch = [pltpu.VMEM((tm, tn), jnp.float32)] if multi_k else []

    # VMEM budget: double-buffered x / w / out / bias tiles (+ f32 accumulator).
    x_b, w_b, o_b, bias_b = (x.dtype.itemsize, w_cat.dtype.itemsize,
                             x.dtype.itemsize, b_cat.dtype.itemsize)
    budget = 2 * (tm * tk * x_b + tk * tn * w_b + tm * tn * o_b + tn * bias_b)
    if multi_k:
        budget += tm * tn * 4
    vmem_limit = None
    if budget > (14 << 20):
        vmem_limit = min(budget + (2 << 20), 64 << 20)

    out = pl.pallas_call(
        kernel,
        out_shape=jax.ShapeDtypeStruct((M_pad, N_pad), x.dtype),
        grid_spec=pltpu.PrefetchScalarGridSpec(
            num_scalar_prefetch=0,
            grid=grid,
            in_specs=[
                pl.BlockSpec((tm, tk), lambda i, j, k: (i, k)),   # x tile
                pl.BlockSpec((tk, tn), lambda i, j, k: (k, j)),   # W_cat tile
                pl.BlockSpec((1, tn), lambda i, j, k: (0, j)),    # bias tile
            ],
            out_specs=pl.BlockSpec((tm, tn), lambda i, j, k: (i, j)),
            scratch_shapes=scratch,
        ),
        compiler_params=pltpu.CompilerParams(
            dimension_semantics=("parallel", "parallel", "arbitrary"),
            vmem_limit_bytes=vmem_limit),
    )(x, w_cat, b_cat)

    if (M_pad, N_pad) != (B, N):
        out = out[:B, :N]
    return out.reshape(B, n_heads, N // n_heads)


# ---------------------------------------------------------------------------
if __name__ == "__main__":
    key = jax.random.PRNGKey(0)
    k_x, k_w, k_b = jax.random.split(key, 3)

    # Small shapes consistent with the module: batch=8, neck=32, d_model=128,
    # and the module's fixed 9 linear "neurons".
    B, neck, d_model, H = 8, 32, 128, 9
    bound = float(neck) ** -0.5          # nn.Linear default init range

    x = jax.random.normal(k_x, (B, neck), jnp.float32)
    weights = jax.random.uniform(k_w, (H, d_model, neck), jnp.float32,
                                 minval=-bound, maxval=bound)
    biases = jax.random.uniform(k_b, (H, d_model), jnp.float32,
                                minval=-bound, maxval=bound)

    # One-time parameter repack (parameter-load time, not per call).
    w_cat, b_cat = pack_neck2seq_params(weights, biases)
    w_cat, b_cat = jax.block_until_ready((w_cat, b_cat))

    out = neck2seq_forward(x, w_cat, b_cat, n_heads=H)
    out = jax.block_until_ready(out)
    assert out.shape == (B, H, d_model), out.shape

    # Reference: 9 separate linears stacked on dim=1 (the PyTorch semantics).
    ref = jnp.stack([x @ weights[h].T + biases[h] for h in range(H)], axis=1)
    max_err = float(jnp.max(jnp.abs(out - ref)))
    assert jnp.allclose(out, ref, atol=2e-3, rtol=2e-3), max_err

    print("KERNEL_OK")
</pallas_src>

<mosaic_0001>
module attributes {stable_mosaic.version = 11 : i64} {
  func.func @_matmul_bias_single_k_kernel(%arg0: i32, %arg1: i32, %arg2: i32, %arg3: memref<8x32xf32, #tpu.memory_space<vmem>>, %arg4: memref<32x1152xf32, #tpu.memory_space<vmem>>, %arg5: memref<1x1152xf32, #tpu.memory_space<vmem>>, %arg6: memref<8x1152xf32, #tpu.memory_space<vmem>>) attributes {dimension_semantics = [#tpu.dimension_semantics<parallel>, #tpu.dimension_semantics<parallel>, #tpu.dimension_semantics<arbitrary>], iteration_bounds = array<i64: 1, 1, 1>, scalar_prefetch = 0 : i64, scratch_operands = 0 : i64, tpu.core_type = #tpu.core_type<tc>, window_params = [{transform_indices = @transform_0, window_bounds = array<i64: 8, 32>}, {transform_indices = @transform_1, window_bounds = array<i64: 32, 1152>}, {transform_indices = @transform_2, window_bounds = array<i64: 1, 1152>}, {transform_indices = @transform_3, window_bounds = array<i64: 8, 1152>}]} {
    %c0 = arith.constant 0 : index
    %c0_0 = arith.constant 0 : index
    %0 = vector.load %arg3[%c0, %c0_0] : memref<8x32xf32, #tpu.memory_space<vmem>>, vector<8x32xf32>
    %c0_1 = arith.constant 0 : index
    %c0_2 = arith.constant 0 : index
    %1 = vector.load %arg4[%c0_1, %c0_2] : memref<32x1152xf32, #tpu.memory_space<vmem>>, vector<32x1152xf32>
    %cst = arith.constant dense<0.000000e+00> : vector<8x1152xf32>
    %2 = tpu.matmul %0, %1, %cst {dimension_numbers = #tpu.dot_dimension_numbers<[1], [0], [0], [1], [0, 0, 1, 1], [], []>} : vector<8x32xf32>, vector<32x1152xf32>, vector<8x1152xf32> -> vector<8x1152xf32>
    %c0_3 = arith.constant 0 : index
    %c0_4 = arith.constant 0 : index
    %3 = vector.load %arg5[%c0_3, %c0_4] : memref<1x1152xf32, #tpu.memory_space<vmem>>, vector<1x1152xf32>
    %4 = vector.broadcast %3 : vector<1x1152xf32> to vector<8x1152xf32>
    %5 = arith.addf %2, %4 : vector<8x1152xf32>
    %c0_5 = arith.constant 0 : index
    %c0_6 = arith.constant 0 : index
    %6 = vector.load %arg6[%c0_5, %c0_6] : memref<8x1152xf32, #tpu.memory_space<vmem>>, vector<8x1152xf32>
    tpu.vector_store %arg6[%c0_5, %c0_6], %5 {strides = array<i32>} : memref<8x1152xf32, #tpu.memory_space<vmem>>, vector<8x1152xf32>,
    return
  }
  func.func @transform_0(%arg0: i32, %arg1: i32, %arg2: i32) -> (i32, i32) {
    %c0_i32 = arith.constant 0 : i32
    return %arg0, %arg2 : i32, i32
  }
  func.func @transform_1(%arg0: i32, %arg1: i32, %arg2: i32) -> (i32, i32) {
    %c0_i32 = arith.constant 0 : i32
    return %arg2, %arg1 : i32, i32
  }
  func.func @transform_2(%arg0: i32, %arg1: i32, %arg2: i32) -> (i32, i32) {
    %c0_i32 = arith.constant 0 : i32
    %c0_i32_0 = arith.constant 0 : i32
    return %c0_i32, %arg1 : i32, i32
  }
  func.func @transform_3(%arg0: i32, %arg1: i32, %arg2: i32) -> (i32, i32) {
    %c0_i32 = arith.constant 0 : i32
    return %arg0, %arg1 : i32, i32
  }
}

</mosaic_0001>

<bundles_post_ra>
// kernel: neck2seq_forward.1
= control target key start
LH: loop header
LB: loop body
LE: loop exit
PB: predicated region body
PF: predicated region fallthrough
CT: control target
= control target key end

     0   :  { %8 = vsyncpa [#allocation3], 0  ;;  %s771_s0 = inlined_call_operand.hbm [shape: f32[8,32], index: 0, kind: input, shape index: {}]   ;;  %s772_s1 = inlined_call_operand.hbm [shape: f32[32,1152], index: 1, kind: input, shape index: {}]   ;;  %s773_s2 = inlined_call_operand.hbm [shape: f32[1,1152], index: 2, kind: input, shape index: {}]   ;;  %s774_s3 = inlined_call_operand.hbm [shape: f32[8,1152], index: 3, kind: output, shape index: {}]  }
   0x1   :  { %9 = vsyncpa [#allocation6], 0 }
   0x2   :  { %10 = vsyncpa [#allocation4], 0  ;;  %s684_s12 = smov [#allocation5]   ;;  %s590_s16 = scalar_lea.hbm %s772_s1, 4608 }
   0x3   :  { %s26_s13 = sshll.u32 %s684_s12, 4  ;;  %p591_p0 = scmp.ne.s32.totalorder %s772_s1, %s590_s16  ;;  %s27_s13 = int_to_ptr.vmem [resolvable:$true] %s26_s13 }
   0x4   :  { %p594_p1 = scmp.lt.u32.totalorder %s590_s16, %s772_s1 }
   0x6   :  { %p596_p2 = pnand %p594_p1, %p591_p0 }
   0x8   :  { %599 = shalt.err (!%p596_p2)
}
   0x9   :  { %s600_s21 = scalar_lea.vmem %s27_s13, 4608  ;;  %p605_p4 = scmp.lt.s32.totalorder %s27_s13, %s27_s13 }
   0xa   :  { %p601_p3 = scmp.ne.s32.totalorder %s27_s13, %s600_s21  ;;  %p606_p5 = scmp.lt.s32.totalorder %s600_s21, %s600_s21 }
   0xc   :  { %p607_p6 = por %p606_p5, %p605_p4 }
   0xe   :  { %p608_p7 = pnand %p607_p6, %p601_p3 }
  0x10   :  { %611 = shalt.err (!%p608_p7)
}
  0x11   :  { %s685_s22 = smov 1152   ;;  %s686_s23 = smov 72  }
  0x12   :  { %32 = dma.hbm_to_vmem [thread:$0]  %s772_s1, 4608, %s27_s13, [#allocation6], %s685_s22, %s685_s22, %s686_s23  }
  0x13   :  { %s687_s26 = smov [#allocation2]   ;;  %s688_s28 = smov [#allocation7]  }
  0x14   :  { %s17_s27 = sshll.u32 %s687_s26, 4  ;;  %s39_s29 = sshll.u32 %s688_s28, 4  ;;  %s18_s27 = int_to_ptr.vmem [resolvable:$true] %s17_s27  ;;  %s40_s29 = int_to_ptr.vmem [resolvable:$true] %s39_s29 }
  0x15   :  { %s612_s5 = scalar_lea.hbm %s771_s0, 128 }
  0x16   :  { %p613_p8 = scmp.ne.s32.totalorder %s771_s0, %s612_s5  ;;  %p616_p9 = scmp.lt.u32.totalorder %s612_s5, %s771_s0 }
  0x18   :  { %p618_p10 = pnand %p616_p9, %p613_p8 }
  0x1a   :  { %621 = shalt.err (!%p618_p10)
}
  0x1b   :  { %s622_s1 = scalar_lea.vmem %s18_s27, 128  ;;  %p627_p12 = scmp.lt.s32.totalorder %s18_s27, %s18_s27 }
  0x1c   :  { %p623_p11 = scmp.ne.s32.totalorder %s18_s27, %s622_s1  ;;  %p628_p13 = scmp.lt.s32.totalorder %s622_s1, %s622_s1 }
  0x1e   :  { %p629_p0 = por %p628_p13, %p627_p12 }
  0x20   :  { %p630_p1 = pnand %p629_p0, %p623_p11 }
  0x22   :  { %633 = shalt.err (!%p630_p1)
}
  0x23   :  { %20 = dma.hbm_to_vmem [thread:$0]  %s771_s0, 128, %s18_s27, [#allocation3]  }
  0x24   :  { %s634_s14 = scalar_lea.hbm %s773_s2, 144 }
  0x25   :  { %p635_p2 = scmp.ne.s32.totalorder %s773_s2, %s634_s14  ;;  %p638_p3 = scmp.lt.u32.totalorder %s634_s14, %s773_s2 }
  0x27   :  { %p640_p4 = pnand %p638_p3, %p635_p2 }
  0x29   :  { %643 = shalt.err (!%p640_p4)
}
  0x2a   :  { %s644_s19 = scalar_lea.vmem %s40_s29, 144  ;;  %s648_s20 = scalar_lea.vmem %s40_s29, 160 }
  0x2b   :  { %p645_p5 = scmp.ne.s32.totalorder %s40_s29, %s644_s19  ;;  %p649_p6 = scmp.lt.s32.totalorder %s40_s29, %s40_s29 }
  0x2c   :  { %p650_p7 = scmp.lt.s32.totalorder %s648_s20, %s644_s19 }
  0x2e   :  { %p651_p8 = por %p650_p7, %p649_p6 }
  0x30   :  { %p652_p9 = pnand %p651_p8, %p645_p5 }
  0x32   :  { %655 = shalt.err (!%p652_p9)
}
  0x33   :  { %42 = dma.hbm_to_vmem [thread:$0]  %s773_s2, 144, %s40_s29, [#allocation6]  }
  0x34   :  { %678 = dma.done.wait [#allocation3], 128  }
  0x35   :  { %679 = vsyncadd [#allocation3], 4294967168 }
  0x36   :  { %680 = dma.done.wait [#allocation6], 4752  }
  0x37   :  { %681 = vsyncadd [#allocation6], 4294962544  ;;  %v689_v0 = vmov 0.0   ;;  %v54_v1 = vld [vmem:[#allocation5 + $0x8] sm:$0xff]  ;;  %v63_v2 = vld [vmem:[#allocation5 + $0x50] sm:$0xff]  ;;  %vm138_vm0 = vcmask 261120   ;;  %v93_v57 = vlaneseq }
  0x38   :  { %206 = vmatprep.mubr.f32.mxu0 %v689_v0  ;;  %277 = vmatprep.mubr.f32.mxu1 %v689_v0  ;;  %v53_v3 = vld [vmem:[#allocation5] sm:$0xff]  ;;  %v543_v4 = vpack.c.bf16 %v63_v2, %v54_v1  ;;  %v62_v5 = vld [vmem:[#allocation5 + $0x48] sm:$0xff]  ;;  %v72_v6 = vld [vmem:[#allocation5 + $0x98] sm:$0xff]  ;;  %v690_v53 = vmov 0.0|0.0   ;;  %vm691_vm1 = vmmov 0   ;;  %s692_s2 = smov [#allocation8]  }
  0x39   :  { %v81_v7 = vld [vmem:[#allocation5 + $0xe0] sm:$0xff]  ;;  %v545_v8 = vpack.c.bf16 %v62_v5, %v53_v3  ;;  %v71_v10 = vld [vmem:[#allocation5 + $0x90] sm:$0xff]  ;;  %v80_v11 = vld [vmem:[#allocation5 + $0xd8] sm:$0xff]  ;;  %v94_v58 = vshrl.u32 %v93_v57, 7  ;;  %s511_s22 = sshll.u32 %s692_s2, 4  ;;  %s512_s22 = int_to_ptr.vmem [resolvable:$true] %s511_s22 }
  0x3a   :  { %v547_v9 = vpack.c.bf16 %v81_v7, %v72_v6  ;;  %v56_v12 = vld [vmem:[#allocation5 + $0x18] sm:$0xff]  ;;  %544 = vmatprep.subr.bf16.mxu0 %v543_v4  ;;  %v65_v13 = vld [vmem:[#allocation5 + $0x60] sm:$0xff]  ;;  %v55_v14 = vld [vmem:[#allocation5 + $0x10] sm:$0xff]  ;;  %v549_v16 = vpack.c.bf16 %v80_v11, %v71_v10  ;;  %s656_s23 = scalar_lea.vmem %s512_s22, 1152  ;;  %p661_p11 = scmp.lt.s32.totalorder %s512_s22, %s512_s22 }
  0x3b   :  { %v64_v15 = vld [vmem:[#allocation5 + $0x58] sm:$0xff]  ;;  %546 = vmatpush1.bf16.msra.mxu0 %v545_v8  ;;  %v551_v17 = vpack.c.bf16 %v65_v13, %v56_v12  ;;  %v58_v19 = vld [vmem:[#allocation5 + $0x28] sm:$0xff]  ;;  %v67_v20 = vld [vmem:[#allocation5 + $0x70] sm:$0xff]  ;;  %v95_v59 = vsub.s32 0, %v94_v58  ;;  %v99_v61 = vsub.s32 1, %v94_v58  ;;  %v103_v62 = vsub.s32 2, %v94_v58  ;;  %p657_p10 = scmp.ne.s32.totalorder %s512_s22, %s656_s23  ;;  %p662_p12 = scmp.lt.s32.totalorder %s656_s23, %s656_s23 }
  0x3c   :  { %v553_v18 = vpack.c.bf16 %v64_v15, %v55_v14  ;;  %548 = vmatprep.subr.bf16.mxu0 %v547_v9  ;;  %v559_v21 = vpack.c.bf16 %v67_v20, %v58_v19  ;;  %v57_v22 = vld [vmem:[#allocation5 + $0x20] sm:$0xff]  ;;  %v66_v23 = vld [vmem:[#allocation5 + $0x68] sm:$0xff]  ;;  %v83_v25 = vld [vmem:[#allocation5 + $0xf0] sm:$0xff]  ;;  %v107_v1 = vsub.s32 3, %v94_v58  ;;  %v111_v7 = vsub.s32 4, %v94_v58 }
  0x3d   :  { %v74_v24 = vld [vmem:[#allocation5 + $0xa8] sm:$0xff]  ;;  %552 = vmatprep.subr.bf16.mxu1 %v551_v17  ;;  %v73_v26 = vld [vmem:[#allocation5 + $0xa0] sm:$0xff]  ;;  %v52_v28 = vld [vmem:[#allocation2] sm:$0xff]  ;;  %v561_v33 = vpack.c.bf16 %v66_v23, %v57_v22  ;;  %v115_v9 = vsub.s32 5, %v94_v58  ;;  %v119_v13 = vsub.s32 6, %v94_v58  ;;  %p663_p13 = por %p662_p12, %p661_p11 }
  0x3e   :  { %v82_v27 = vld [vmem:[#allocation5 + $0xe8] sm:$0xff]  ;;  %554 = vmatpush1.bf16.msra.mxu1 %v553_v18  ;;  %v555_v29 = vpack.c.bf16 %v83_v25, %v74_v24  ;;  %v76_v31 = vld [vmem:[#allocation5 + $0xb8] sm:$0xff]  ;;  %v85_v32 = vld [vmem:[#allocation5 + $0x100] sm:$0xff] }
  0x3f   :  { %v557_v30 = vpack.c.bf16 %v82_v27, %v73_v26  ;;  %550 = vmatpush1.bf16.msra.mxu0 %v549_v16  ;;  %v75_v34 = vld [vmem:[#allocation5 + $0xb0] sm:$0xff]  ;;  %v60_v35 = vld [vmem:[#allocation5 + $0x38] sm:$0xff]  ;;  %v69_v36 = vld [vmem:[#allocation5 + $0x80] sm:$0xff]  ;;  %v563_v37 = vpack.c.bf16 %v85_v32, %v76_v31  ;;  %v123_v16 = vsub.s32 7, %v94_v58  ;;  %p664_p0 = pnand %p663_p13, %p657_p10 }
  0x40   :  { %560 = vmatprep.subr.bf16.mxu0 %v559_v21  ;;  %556 = vmatprep.subr.bf16.mxu1 %v555_v29  ;;  %v84_v38 = vld [vmem:[#allocation5 + $0xf8] sm:$0xff]  ;;  %v567_v39 = vpack.c.bf16 %v69_v36, %v60_v35  ;;  %v59_v40 = vld [vmem:[#allocation5 + $0x30] sm:$0xff]  ;;  %v78_v42 = vld [vmem:[#allocation5 + $0xc8] sm:$0xff] }
  0x41   :  { %v68_v41 = vld [vmem:[#allocation5 + $0x78] sm:$0xff]  ;;  %v87_v43 = vld [vmem:[#allocation5 + $0x110] sm:$0xff]  ;;  %v565_v45 = vpack.c.bf16 %v84_v38, %v75_v34  ;;  %v77_v47 = vld [vmem:[#allocation5 + $0xc0] sm:$0xff] }
  0x42   :  { %522 = vmatmul.mubr.msk.f32.vlgmr.msra.gmra.mrb[0].mxu0 %vm138_vm0, %v52_v28  ;;  %558 = vmatpush1.bf16.msra.mxu1 %v557_v30  ;;  %v569_v44 = vpack.c.bf16 %v68_v41, %v59_v40  ;;  %v571_v46 = vpack.c.bf16 %v87_v43, %v78_v42  ;;  %v86_v48 = vld [vmem:[#allocation5 + $0x108] sm:$0xff]  ;;  %v61_v49 = vld [vmem:[#allocation5 + $0x40] sm:$0xff]  ;;  %v79_v54 = vld [vmem:[#allocation5 + $0xd0] sm:$0xff] }
  0x43   :  { %562 = vmatpush1.bf16.msra.mxu0 %v561_v33  ;;  %568 = vmatprep.subr.bf16.mxu1 %v567_v39  ;;  %v70_v50 = vld [vmem:[#allocation5 + $0x88] sm:$0xff]  ;;  %v573_v51 = vpack.c.bf16 %v86_v48, %v77_v47  ;;  %v88_v55 = vld [vmem:[#allocation5 + $0x118] sm:$0xff]  ;;  %v89_v60 = vld [vmem:[#allocation7] sm:$0xff] }
  0x44   :  { %564 = vmatprep.subr.bf16.mxu0 %v563_v37  ;;  %348 = vmatprep.mubr.f32.mxu0 %v689_v0  ;;  %v576_v52 = vpack.c.bf16 %v70_v50, %v61_v49  ;;  %v579_v56 = vpack.c.bf16 %v88_v55, %v79_v54  ;;  %v96_v63 = vrot.slane %v89_v60, %v95_v59 }
  0x45   :  { %523 = vmatmul.mubr.msk.f32.vlgmr.msra.gmra.mrb[0].mxu1 %vm138_vm0, %v52_v28  ;;  %v100_v2 = vrot.slane %v89_v60, %v99_v61  ;;  %v104_v4 = vrot.slane %v89_v60, %v103_v62  ;;  %v112_v15 = vrot.slane %v89_v60, %v111_v7  ;;  %v116_v17 = vrot.slane %v89_v60, %v115_v9 }
  0x46   :  { %570 = vmatpush1.bf16.msra.mxu1 %v569_v44  ;;  %419 = vmatprep.mubr.f32.mxu1 %v689_v0  ;;  %v120_v19 = vrot.slane %v89_v60, %v119_v13  ;;  %v124_v22 = vrot.slane %v89_v60, %v123_v16 }
  0x47   :  { %566 = vmatpush1.bf16.msra.mxu0 %v565_v45  ;;  %572 = vmatprep.subr.bf16.mxu1 %v571_v46 }
  0x48   :  { %575 = vmatprep.subr.bf16.mxu0 %v690_v53 }
  0x4a   :  { %524 = vmatmul.mubr.msk.f32.vlgmr.msra.gmra.mrb[2].mxu0 %vm138_vm0, %v52_v28  ;;  %574 = vmatpush1.bf16.msra.mxu1 %v573_v51 }
  0x4b   :  { %577 = vmatpush3.bf16.msra.mxu0 %v576_v52  ;;  %540 = vmatprep.mubr.msk.f32.mxu0 %vm691_vm1, %v689_v0  ;;  %v108_v0 = vrot.slane %v89_v60, %v107_v1 }
  0x4c   :  { %578 = vmatprep.subr.bf16.mxu0 %v690_v53 }
  0x4d   :  { %525 = vmatmul.mubr.msk.f32.vlgmr.msra.gmra.mrb[2].mxu1 %vm138_vm0, %v52_v28 }
  0x4f   :  { %580 = vmatpush3.bf16.msra.mxu0 %v579_v56 }
  0x52   :  { %541 = vmatmul.mubr.msk.f32.vlgmr.msra.gmra.mrb[4].mxu0 %vm138_vm0, %v52_v28  ;;  %v521_v28 = vld [vmem:[#allocation7 + $0x8] ss:$0 sm:$0xff] }
 0x115   :  { %v208_v3 = vpop.f32.mrb[0].mxu0 }
 0x116   :  { %v209_v5 = vadd.f32 %v208_v3, %v96_v63  ;;  %v210_v6 = vpop.f32.mrb[1].mxu0 }
 0x117   :  { %v211_v8 = vadd.f32 %v210_v6, %v100_v2 }
 0x118   :  { %496 = vst [vmem:[#allocation8] sm:$0xff] %v209_v5  ;;  %v279_v10 = vpop.f32.mrb[0].mxu1 }
 0x119   :  { %497 = vst [vmem:[#allocation8 + $0x8] sm:$0xff] %v211_v8  ;;  %v280_v11 = vadd.f32 %v279_v10, %v104_v4  ;;  %v281_v12 = vpop.f32.mrb[1].mxu1 }
 0x11a   :  { %v282_v14 = vadd.f32 %v281_v12, %v108_v0 }
 0x11b   :  { %498 = vst [vmem:[#allocation8 + $0x10] sm:$0xff] %v280_v11 }
 0x11c   :  { %499 = vst [vmem:[#allocation8 + $0x18] sm:$0xff] %v282_v14 }
 0x11d   :  { %v350_v18 = vpop.f32.mrb[2].mxu0 }
 0x11e   :  { %v351_v20 = vadd.f32 %v350_v18, %v112_v15  ;;  %v352_v21 = vpop.f32.mrb[3].mxu0 }
 0x11f   :  { %v353_v23 = vadd.f32 %v352_v21, %v116_v17 }
 0x120   :  { %500 = vst [vmem:[#allocation8 + $0x20] sm:$0xff] %v351_v20  ;;  %v421_v24 = vpop.f32.mrb[2].mxu1 }
 0x121   :  { %501 = vst [vmem:[#allocation8 + $0x28] sm:$0xff] %v353_v23  ;;  %v422_v25 = vadd.f32 %v421_v24, %v120_v19  ;;  %v423_v26 = vpop.f32.mrb[3].mxu1 }
 0x122   :  { %v424_v27 = vadd.f32 %v423_v26, %v124_v22 }
 0x123   :  { %502 = vst [vmem:[#allocation8 + $0x30] sm:$0xff] %v422_v25 }
 0x124   :  { %503 = vst [vmem:[#allocation8 + $0x38] sm:$0xff] %v424_v27 }
 0x125   :  { %v492_v29 = vpop.f32.mrb[4].mxu0 }
 0x126   :  { %v493_v30 = vadd.f32 %v521_v28, %v492_v29  ;;  %v542_v31 = vpop.f32.mrb[5].mxu0 }
 0x128   :  { %504 = vst [vmem:[#allocation8 + $0x40] sm:$0xff] %v493_v30 }
 0x129   :  { %667 = shalt.err (!%p664_p0)
}
 0x12a   :  { %s668_s26 = scalar_lea.hbm %s774_s3, 1152 }
 0x12b   :  { %p669_p1 = scmp.ne.s32.totalorder %s774_s3, %s668_s26  ;;  %p672_p2 = scmp.lt.u32.totalorder %s668_s26, %s774_s3 }
 0x12d   :  { %p674_p3 = pnand %p672_p2, %p669_p1 }
 0x12f   :  { %677 = shalt.err (!%p674_p3)
}
 0x130   :  { %514 = dma.vmem_to_hbm [thread:$0]  %s512_s22, 1152, %s774_s3, [#allocation4]  }
 0x131   :  { %682 = dma.done.wait [#allocation4], 1152  }
 0x132   :  { %683 = vsyncadd [#allocation4], 4294966144 }
 0x133   :  { %518 = vsyncpa [#allocation3], 1 }
 0x134   :  { %519 = vsyncpa [#allocation6], 1 }
 0x135   :  { %520 = vsyncpa [#allocation4], 1 }

</bundles_post_ra>
